<compile_context>
chip_gen: v5e
topology: v5e:2x2
jax: 0.10.0
libtpu: 0.0.40
codegen_flags: <defaults>
</compile_context>

<pallas_src>
import jax
import jax.numpy as jnp
from jax.experimental import pallas as pl
from jax.experimental.pallas import tpu as pltpu

_LANE = 128
_SUBLANE = 8
# ~2 MiB per block: double-buffered input + output tiles = 4x block bytes
# = 8 MiB, safely under the default scoped-VMEM limit on v5e (16 MiB),
# v6e (32 MiB) and v7x (32 MiB of 64 MiB physical).  No vmem_limit_bytes
# override needed.
_BLOCK_BYTES = 2 * 1024 * 1024


def _copy_kernel(x_ref, o_ref):
    # Pass-through of the current (tile_r, 128) block.
    o_ref[...] = x_ref[...]


def backbone_forward(x: jax.Array) -> jax.Array:
    """Pass-through 'backbone': lane-dense, input-aliased Pallas copy kernel."""
    orig_shape = x.shape
    total = x.size
    dtype = x.dtype

    # Lane-dense flatten: fold everything into a (rows, 128) slab so every
    # HBM byte moved is payload.  Pad only the flat tail (at most 1023
    # elements) if total is not a multiple of 8*128 -- a last resort that the
    # demo shape (8192 elements) never hits.
    tail = (-total) % (_SUBLANE * _LANE)
    flat = x.reshape(-1)
    if tail:
        flat = jnp.concatenate([flat, jnp.zeros((tail,), dtype)])
    rows = flat.size // _LANE
    x2d = flat.reshape(rows, _LANE)

    # Largest row tile (multiple of 8, under the block byte budget) that also
    # divides `rows`; small inputs become a single full-array block.
    bytes_per_row = _LANE * jnp.dtype(dtype).itemsize
    max_tile = max(_SUBLANE,
                   (_BLOCK_BYTES // bytes_per_row) // _SUBLANE * _SUBLANE)
    tile_r = min(rows, max_tile)
    while rows % tile_r:          # rows is a multiple of 8, so this terminates
        tile_r -= _SUBLANE
    grid = (rows // tile_r,)

    out2d = pl.pallas_call(
        _copy_kernel,
        out_shape=jax.ShapeDtypeStruct((rows, _LANE), dtype),
        grid_spec=pltpu.PrefetchScalarGridSpec(
            num_scalar_prefetch=0,
            grid=grid,
            in_specs=[pl.BlockSpec((tile_r, _LANE), lambda i: (i, 0))],
            out_specs=pl.BlockSpec((tile_r, _LANE), lambda i: (i, 0)),
        ),
        # Alias the output onto the input HBM buffer: no re-materialization
        # for what is a zero-compute identity.
        input_output_aliases={0: 0},
        compiler_params=pltpu.CompilerParams(
            dimension_semantics=("parallel",),
        ),
    )(x2d)

    out_flat = out2d.reshape(-1)
    if tail:
        out_flat = out_flat[:total]
    return out_flat.reshape(orig_shape)


if __name__ == "__main__":
    key = jax.random.PRNGKey(0)
    # Small NCHW input consistent with a conv-style backbone.
    x = jax.random.normal(key, (2, 4, 16, 16), dtype=jnp.float32)

    # Keep a host-side reference copy, since x's device buffer is donated to
    # the kernel (making the input/output alias a true in-place operation).
    x_host = jax.device_get(x)

    fwd = jax.jit(backbone_forward, donate_argnums=0)
    y = fwd(x)
    jax.block_until_ready(y)

    assert y.shape == x_host.shape
    assert jnp.allclose(y, x_host)
    print("KERNEL_OK")
</pallas_src>

<mosaic_0001>
module attributes {stable_mosaic.version = 11 : i64} {
  func.func @_copy_kernel(%arg0: i32, %arg1: memref<16x128xf32, #tpu.memory_space<vmem>>, %arg2: memref<16x128xf32, #tpu.memory_space<vmem>>) attributes {dimension_semantics = [#tpu.dimension_semantics<parallel>], iteration_bounds = array<i64: 1>, scalar_prefetch = 0 : i64, scratch_operands = 0 : i64, tpu.core_type = #tpu.core_type<tc>, window_params = [{transform_indices = @transform_0, window_bounds = array<i64: 16, 128>}, {transform_indices = @transform_1, window_bounds = array<i64: 16, 128>}]} {
    %c0 = arith.constant 0 : index
    %c0_0 = arith.constant 0 : index
    %0 = vector.load %arg1[%c0, %c0_0] : memref<16x128xf32, #tpu.memory_space<vmem>>, vector<16x128xf32>
    %c0_1 = arith.constant 0 : index
    %c0_2 = arith.constant 0 : index
    %1 = vector.load %arg2[%c0_1, %c0_2] : memref<16x128xf32, #tpu.memory_space<vmem>>, vector<16x128xf32>
    tpu.vector_store %arg2[%c0_1, %c0_2], %0 {strides = array<i32>} : memref<16x128xf32, #tpu.memory_space<vmem>>, vector<16x128xf32>,
    return
  }
  func.func @transform_0(%arg0: i32) -> (i32, i32) {
    %c0_i32 = arith.constant 0 : i32
    %c0_i32_0 = arith.constant 0 : i32
    return %arg0, %c0_i32 : i32, i32
  }
  func.func @transform_1(%arg0: i32) -> (i32, i32) {
    %c0_i32 = arith.constant 0 : i32
    %c0_i32_0 = arith.constant 0 : i32
    return %arg0, %c0_i32 : i32, i32
  }
}

</mosaic_0001>

<bundles_post_ra>
// kernel: backbone_forward.1
= control target key start
LH: loop header
LB: loop body
LE: loop exit
PB: predicated region body
PF: predicated region fallthrough
CT: control target
= control target key end

     0   :  { %s38_s0 = inlined_call_operand.vmem [shape: f32[16,128], index: 0, kind: input, shape index: {}, may-alias: {0,1}]   ;;  %s39_s1 = inlined_call_operand.vmem [shape: f32[16,128], index: 1, kind: output, shape index: {}, may-alias: {0,1}]  }
   0x1   :  { %v8_v0 = vld [vmem:[%s38_s0] sm:$0xff]  ;;  %v9_v1 = vld [vmem:[%s38_s0 + $0x8] sm:$0xff] }
   0x2   :  { %10 = vst [vmem:[%s39_s1] sm:$0xff] %v8_v0 }
   0x3   :  { %11 = vst [vmem:[%s39_s1 + $0x8] sm:$0xff] %v9_v1 }

</bundles_post_ra>
